<compile_context>
chip_gen: v5e
topology: v5e:2x2
jax: 0.10.0
libtpu: 0.0.40
codegen_flags: <defaults>
</compile_context>

<pallas_src>
import functools

import jax
import jax.numpy as jnp
from jax.experimental import pallas as pl
from jax.experimental.pallas import tpu as pltpu

_VMEM_LIMIT_BYTES = 32 * 1024 * 1024  # safe on v5e/v6e/v7x; tiles use ~2 MiB


def _round_up(x, m):
    return ((x + m - 1) // m) * m


def _pad2(arr, rows, cols):
    return jnp.pad(arr, ((0, rows - arr.shape[0]), (0, cols - arr.shape[1])))


# --------------------------------------------------------------------------
# Kernels
# --------------------------------------------------------------------------
def _prop_fused_kernel(a_ref, f_ref, w_ref, b_ref, o_ref, acc_ref, *, relu):
    """out_tile = act( (sum_k A[i,k] @ F[k]) @ W + b ).  Reduction axis = grid axis 1."""
    @pl.when(pl.program_id(1) == 0)
    def _init():
        acc_ref[...] = jnp.zeros_like(acc_ref)

    # bf16 x bf16 -> f32 accumulate on the MXU (the only O(N^2) matmul).
    acc_ref[...] += jnp.dot(a_ref[...], f_ref[...],
                            preferred_element_type=jnp.float32)

    @pl.when(pl.program_id(1) == pl.num_programs(1) - 1)
    def _finalize():
        out = jnp.dot(acc_ref[...], w_ref[...],
                      preferred_element_type=jnp.float32) + b_ref[...]
        if relu:
            out = jnp.maximum(out, 0.0)
        o_ref[...] = out.astype(o_ref.dtype)


def _prop_premul_kernel(a_ref, fw_ref, b_ref, o_ref, acc_ref, *, relu):
    """out_tile = act( (sum_k A[i,k] @ (F@W)[k]) + b ).  F@W precomputed."""
    @pl.when(pl.program_id(1) == 0)
    def _init():
        acc_ref[...] = jnp.zeros_like(acc_ref)

    acc_ref[...] += jnp.dot(a_ref[...], fw_ref[...],
                            preferred_element_type=jnp.float32)

    @pl.when(pl.program_id(1) == pl.num_programs(1) - 1)
    def _finalize():
        out = acc_ref[...] + b_ref[...]
        if relu:
            out = jnp.maximum(out, 0.0)
        o_ref[...] = out.astype(o_ref.dtype)


def _feat_weight_kernel(f_ref, w_ref, o_ref):
    """Small per-row-tile matmul F @ W (used for the X@W-first association)."""
    o_ref[...] = jnp.dot(f_ref[...].astype(jnp.float32), w_ref[...],
                         preferred_element_type=jnp.float32).astype(o_ref.dtype)


# --------------------------------------------------------------------------
# Pallas-call wrappers
# --------------------------------------------------------------------------
def _feat_times_weight(feat_bf16, w_f32, tm):
    n_pad, d_in = feat_bf16.shape
    d_out = w_f32.shape[1]
    return pl.pallas_call(
        _feat_weight_kernel,
        out_shape=jax.ShapeDtypeStruct((n_pad, d_out), jnp.bfloat16),
        grid_spec=pltpu.PrefetchScalarGridSpec(
            num_scalar_prefetch=0,
            grid=(n_pad // tm,),
            in_specs=[
                pl.BlockSpec((tm, d_in), lambda i: (i, 0)),
                pl.BlockSpec((d_in, d_out), lambda i: (0, 0)),
            ],
            out_specs=pl.BlockSpec((tm, d_out), lambda i: (i, 0)),
        ),
        compiler_params=pltpu.CompilerParams(
            dimension_semantics=("parallel",),
            vmem_limit_bytes=_VMEM_LIMIT_BYTES),
    )(feat_bf16, w_f32)


def _propagate(a_bf16, feat_bf16, w_f32, b_f32, *, relu, out_dtype, tm, tk):
    """One GraphConv layer: act(A @ feat @ W + b) on pre-padded operands."""
    n_pad = a_bf16.shape[0]
    d_in = feat_bf16.shape[1]
    d_out = w_f32.shape[1]
    grid = (n_pad // tm, n_pad // tk)
    dim_sem = ("parallel", "arbitrary")

    if d_in <= d_out:
        # (A @ F) @ W : the N^2 matmul contracts against the narrower d_in.
        return pl.pallas_call(
            functools.partial(_prop_fused_kernel, relu=relu),
            out_shape=jax.ShapeDtypeStruct((n_pad, d_out), out_dtype),
            grid_spec=pltpu.PrefetchScalarGridSpec(
                num_scalar_prefetch=0,
                grid=grid,
                in_specs=[
                    pl.BlockSpec((tm, tk), lambda i, k: (i, k)),       # A tile
                    pl.BlockSpec((tk, d_in), lambda i, k: (k, 0)),     # feat tile
                    pl.BlockSpec((d_in, d_out), lambda i, k: (0, 0)),  # W (resident)
                    pl.BlockSpec((1, d_out), lambda i, k: (0, 0)),     # bias
                ],
                out_specs=pl.BlockSpec((tm, d_out), lambda i, k: (i, 0)),
                scratch_shapes=[pltpu.VMEM((tm, d_in), jnp.float32)],
            ),
            compiler_params=pltpu.CompilerParams(
                dimension_semantics=dim_sem,
                vmem_limit_bytes=_VMEM_LIMIT_BYTES),
        )(a_bf16, feat_bf16, w_f32, b_f32)
    else:
        # A @ (F @ W) : precompute the narrow F@W, then stream it.
        fw = _feat_times_weight(feat_bf16, w_f32, tm)
        return pl.pallas_call(
            functools.partial(_prop_premul_kernel, relu=relu),
            out_shape=jax.ShapeDtypeStruct((n_pad, d_out), out_dtype),
            grid_spec=pltpu.PrefetchScalarGridSpec(
                num_scalar_prefetch=0,
                grid=grid,
                in_specs=[
                    pl.BlockSpec((tm, tk), lambda i, k: (i, k)),       # A tile
                    pl.BlockSpec((tk, d_out), lambda i, k: (k, 0)),    # (F@W) tile
                    pl.BlockSpec((1, d_out), lambda i, k: (0, 0)),     # bias
                ],
                out_specs=pl.BlockSpec((tm, d_out), lambda i, k: (i, 0)),
                scratch_shapes=[pltpu.VMEM((tm, d_out), jnp.float32)],
            ),
            compiler_params=pltpu.CompilerParams(
                dimension_semantics=dim_sem,
                vmem_limit_bytes=_VMEM_LIMIT_BYTES),
        )(a_bf16, fw, b_f32)


def gcn_forward(a_norm, x, w1, b1, w2, b2):
    """Full 2-layer GCN forward: relu(A@X@W1+b1) -> A@h@W2+b2, sliced to real shape."""
    N, in_feats = x.shape
    h_feats = w1.shape[1]
    num_classes = w2.shape[1]

    # Pad the node axis and every feature/class axis to lane-dense 128 multiples.
    n_pad = _round_up(N, 128)
    tm = 256 if n_pad % 256 == 0 else 128                       # row tile (parallel)
    tk = 512 if n_pad % 512 == 0 else (256 if n_pad % 256 == 0 else 128)  # K tile
    f_in = _round_up(in_feats, 128)
    f_h = _round_up(h_feats, 128)
    f_c = _round_up(num_classes, 128)

    a_p = _pad2(a_norm, n_pad, n_pad).astype(jnp.bfloat16)      # only O(N^2) operand
    x_p = _pad2(x, n_pad, f_in).astype(jnp.bfloat16)
    w1_p = _pad2(w1, f_in, f_h).astype(jnp.float32)
    b1_p = _pad2(b1.reshape(1, -1), 1, f_h).astype(jnp.float32)
    w2_p = _pad2(w2, f_h, f_c).astype(jnp.float32)
    b2_p = _pad2(b2.reshape(1, -1), 1, f_c).astype(jnp.float32)

    # Layer 1: GraphConv + ReLU (h1 kept bf16 so it can stream into layer 2's MXU).
    h1 = _propagate(a_p, x_p, w1_p, b1_p, relu=True,
                    out_dtype=jnp.bfloat16, tm=tm, tk=tk)
    # Layer 2: GraphConv (no activation), f32 logits.
    out = _propagate(a_p, h1, w2_p, b2_p, relu=False,
                     out_dtype=jnp.float32, tm=tm, tk=tk)

    return out[:N, :num_classes]


# --------------------------------------------------------------------------
# Glue: graph construction and reference
# --------------------------------------------------------------------------
def build_normalized_adjacency(key, num_nodes, edge_prob=0.3):
    """Random undirected graph + self loops, D^{-1/2}(A+I)D^{-1/2}. Plain-JAX glue."""
    upper = (jax.random.uniform(key, (num_nodes, num_nodes)) < edge_prob).astype(jnp.float32)
    upper = jnp.triu(upper, k=1)
    adj = upper + upper.T + jnp.eye(num_nodes, dtype=jnp.float32)
    deg = adj.sum(axis=1)
    d_inv_sqrt = 1.0 / jnp.sqrt(deg)
    return adj * d_inv_sqrt[:, None] * d_inv_sqrt[None, :]


def reference_forward(a_norm, x, w1, b1, w2, b2):
    """f32 reference mirroring the kernel's bf16 rounding of A, X and h1."""
    a = a_norm.astype(jnp.bfloat16).astype(jnp.float32)
    xf = x.astype(jnp.bfloat16).astype(jnp.float32)
    h = jnp.maximum(a @ (xf @ w1) + b1, 0.0)
    h = h.astype(jnp.bfloat16).astype(jnp.float32)
    return a @ (h @ w2) + b2


if __name__ == "__main__":
    # Small shapes consistent with GCN(in_feats, h_feats, num_classes)
    N, in_feats, h_feats, num_classes = 16, 8, 32, 4

    key = jax.random.PRNGKey(0)
    k_adj, k_x, k_w1, k_w2 = jax.random.split(key, 4)

    a_norm = build_normalized_adjacency(k_adj, N)
    x = jax.random.normal(k_x, (N, in_feats), dtype=jnp.float32)

    # Deterministic parameter init (DGL GraphConv: xavier-style weight, zero bias)
    w1 = jax.random.uniform(k_w1, (in_feats, h_feats), dtype=jnp.float32,
                            minval=-1.0, maxval=1.0) * jnp.sqrt(6.0 / (in_feats + h_feats))
    b1 = jnp.zeros((1, h_feats), dtype=jnp.float32)
    w2 = jax.random.uniform(k_w2, (h_feats, num_classes), dtype=jnp.float32,
                            minval=-1.0, maxval=1.0) * jnp.sqrt(6.0 / (h_feats + num_classes))
    b2 = jnp.zeros((1, num_classes), dtype=jnp.float32)

    out = jax.jit(gcn_forward)(a_norm, x, w1, b1, w2, b2)
    out = jax.block_until_ready(out)

    ref = reference_forward(a_norm, x, w1, b1, w2, b2)
    assert out.shape == (N, num_classes)
    assert jnp.allclose(out, ref, atol=1e-2, rtol=1e-2), \
        f"max abs err {jnp.max(jnp.abs(out - ref))}"

    # nid slicing (forward's `h[nid:nid+1]` branch) is trivial glue outside the kernel:
    nid = 3
    _ = out[nid:nid + 1]

    # TODO(synk): true sparse (edge-list) GraphConv gather/scatter is not expressed here;
    # the graph is densified into a normalized adjacency before the kernels.
    print("KERNEL_OK")
</pallas_src>

<mosaic_0001>
module attributes {stable_mosaic.version = 11 : i64} {
  func.func @_prop_fused_kernel(%arg0: i32, %arg1: i32, %arg2: memref<128x128xbf16, #tpu.memory_space<vmem>>, %arg3: memref<128x128xbf16, #tpu.memory_space<vmem>>, %arg4: memref<128x128xf32, #tpu.memory_space<vmem>>, %arg5: memref<1x128xf32, #tpu.memory_space<vmem>>, %arg6: memref<128x128xbf16, #tpu.memory_space<vmem>>, %arg7: memref<128x128xf32, #tpu.memory_space<vmem>>) attributes {dimension_semantics = [#tpu.dimension_semantics<parallel>, #tpu.dimension_semantics<arbitrary>], iteration_bounds = array<i64: 1, 1>, scalar_prefetch = 0 : i64, scratch_operands = 1 : i64, tpu.core_type = #tpu.core_type<tc>, window_params = [{transform_indices = @transform_0, window_bounds = array<i64: 128, 128>}, {transform_indices = @transform_1, window_bounds = array<i64: 128, 128>}, {pipeline_mode = #tpu.pipeline_mode<synchronous>, transform_indices = @transform_2, window_bounds = array<i64: 128, 128>}, {pipeline_mode = #tpu.pipeline_mode<synchronous>, transform_indices = @transform_3, window_bounds = array<i64: 1, 128>}, {transform_indices = @transform_4, window_bounds = array<i64: 128, 128>}]} {
    %c0_i32 = arith.constant 0 : i32
    %0 = arith.cmpi eq, %arg1, %c0_i32 : i32
    %1 = arith.extui %0 : i1 to i32
    %c0_i32_0 = arith.constant 0 : i32
    %2 = arith.cmpi ne, %1, %c0_i32_0 : i32
    scf.if %2 {
      %cst_10 = arith.constant 0.000000e+00 : f32
      %12 = vector.broadcast %cst_10 : f32 to vector<128x128xf32>
      %c0_11 = arith.constant 0 : index
      %c0_12 = arith.constant 0 : index
      %13 = vector.load %arg7[%c0_11, %c0_12] : memref<128x128xf32, #tpu.memory_space<vmem>>, vector<128x128xf32>
      tpu.vector_store %arg7[%c0_11, %c0_12], %12 {strides = array<i32>} : memref<128x128xf32, #tpu.memory_space<vmem>>, vector<128x128xf32>,
    } else {
    }
    %c0 = arith.constant 0 : index
    %c0_1 = arith.constant 0 : index
    %3 = vector.load %arg7[%c0, %c0_1] : memref<128x128xf32, #tpu.memory_space<vmem>>, vector<128x128xf32>
    %c0_2 = arith.constant 0 : index
    %c0_3 = arith.constant 0 : index
    %4 = vector.load %arg2[%c0_2, %c0_3] : memref<128x128xbf16, #tpu.memory_space<vmem>>, vector<128x128xbf16>
    %c0_4 = arith.constant 0 : index
    %c0_5 = arith.constant 0 : index
    %5 = vector.load %arg3[%c0_4, %c0_5] : memref<128x128xbf16, #tpu.memory_space<vmem>>, vector<128x128xbf16>
    %cst = arith.constant dense<0.000000e+00> : vector<128x128xf32>
    %6 = tpu.matmul %4, %5, %cst {dimension_numbers = #tpu.dot_dimension_numbers<[1], [0], [0], [1], [0, 0, 1, 1], [], []>} : vector<128x128xbf16>, vector<128x128xbf16>, vector<128x128xf32> -> vector<128x128xf32>
    %7 = arith.addf %3, %6 : vector<128x128xf32>
    %c0_6 = arith.constant 0 : index
    %c0_7 = arith.constant 0 : index
    %8 = vector.load %arg7[%c0_6, %c0_7] : memref<128x128xf32, #tpu.memory_space<vmem>>, vector<128x128xf32>
    tpu.vector_store %arg7[%c0_6, %c0_7], %7 {strides = array<i32>} : memref<128x128xf32, #tpu.memory_space<vmem>>, vector<128x128xf32>,
    %c0_i32_8 = arith.constant 0 : i32
    %9 = arith.cmpi eq, %arg1, %c0_i32_8 : i32
    %10 = arith.extui %9 : i1 to i32
    %c0_i32_9 = arith.constant 0 : i32
    %11 = arith.cmpi ne, %10, %c0_i32_9 : i32
    scf.if %11 {
      %c0_10 = arith.constant 0 : index
      %c0_11 = arith.constant 0 : index
      %12 = vector.load %arg7[%c0_10, %c0_11] : memref<128x128xf32, #tpu.memory_space<vmem>>, vector<128x128xf32>
      %c0_12 = arith.constant 0 : index
      %c0_13 = arith.constant 0 : index
      %13 = vector.load %arg4[%c0_12, %c0_13] : memref<128x128xf32, #tpu.memory_space<vmem>>, vector<128x128xf32>
      %cst_14 = arith.constant dense<0.000000e+00> : vector<128x128xf32>
      %14 = tpu.matmul %12, %13, %cst_14 {dimension_numbers = #tpu.dot_dimension_numbers<[1], [0], [0], [1], [0, 0, 1, 1], [], []>} : vector<128x128xf32>, vector<128x128xf32>, vector<128x128xf32> -> vector<128x128xf32>
      %c0_15 = arith.constant 0 : index
      %c0_16 = arith.constant 0 : index
      %15 = vector.load %arg5[%c0_15, %c0_16] : memref<1x128xf32, #tpu.memory_space<vmem>>, vector<1x128xf32>
      %16 = vector.broadcast %15 : vector<1x128xf32> to vector<128x128xf32>
      %17 = arith.addf %14, %16 : vector<128x128xf32>
      %cst_17 = arith.constant 0.000000e+00 : f32
      %18 = vector.broadcast %cst_17 : f32 to vector<128x128xf32>
      %19 = arith.maximumf %17, %18 : vector<128x128xf32>
      %20 = arith.truncf %19 : vector<128x128xf32> to vector<128x128xbf16>
      %c0_18 = arith.constant 0 : index
      %c0_19 = arith.constant 0 : index
      %21 = vector.load %arg6[%c0_18, %c0_19] : memref<128x128xbf16, #tpu.memory_space<vmem>>, vector<128x128xbf16>
      tpu.vector_store %arg6[%c0_18, %c0_19], %20 {strides = array<i32>} : memref<128x128xbf16, #tpu.memory_space<vmem>>, vector<128x128xbf16>,
    } else {
    }
    return
  }
  func.func @transform_0(%arg0: i32, %arg1: i32) -> (i32, i32) {
    %c0_i32 = arith.constant 0 : i32
    return %arg0, %arg1 : i32, i32
  }
  func.func @transform_1(%arg0: i32, %arg1: i32) -> (i32, i32) {
    %c0_i32 = arith.constant 0 : i32
    %c0_i32_0 = arith.constant 0 : i32
    return %arg1, %c0_i32 : i32, i32
  }
  func.func @transform_2(%arg0: i32, %arg1: i32) -> (i32, i32) {
    %c0_i32 = arith.constant 0 : i32
    %c0_i32_0 = arith.constant 0 : i32
    %c0_i32_1 = arith.constant 0 : i32
    return %c0_i32, %c0_i32_0 : i32, i32
  }
  func.func @transform_3(%arg0: i32, %arg1: i32) -> (i32, i32) {
    %c0_i32 = arith.constant 0 : i32
    %c0_i32_0 = arith.constant 0 : i32
    %c0_i32_1 = arith.constant 0 : i32
    return %c0_i32, %c0_i32_0 : i32, i32
  }
  func.func @transform_4(%arg0: i32, %arg1: i32) -> (i32, i32) {
    %c0_i32 = arith.constant 0 : i32
    %c0_i32_0 = arith.constant 0 : i32
    return %arg0, %c0_i32 : i32, i32
  }
}

module attributes {stable_mosaic.version = 11 : i64} {
  func.func @_prop_fused_kernel(%arg0: i32, %arg1: i32, %arg2: memref<128x128xbf16, #tpu.memory_space<vmem>>, %arg3: memref<128x128xbf16, #tpu.memory_space<vmem>>, %arg4: memref<128x128xf32, #tpu.memory_space<vmem>>, %arg5: memref<1x128xf32, #tpu.memory_space<vmem>>, %arg6: memref<128x128xf32, #tpu.memory_space<vmem>>, %arg7: memref<128x128xf32, #tpu.memory_space<vmem>>) attributes {dimension_semantics = [#tpu.dimension_semantics<parallel>, #tpu.dimension_semantics<arbitrary>], iteration_bounds = array<i64: 1, 1>, scalar_prefetch = 0 : i64, scratch_operands = 1 : i64, tpu.core_type = #tpu.core_type<tc>, window_params = [{transform_indices = @transform_0, window_bounds = array<i64: 128, 128>}, {transform_indices = @transform_1, window_bounds = array<i64: 128, 128>}, {pipeline_mode = #tpu.pipeline_mode<synchronous>, transform_indices = @transform_2, window_bounds = array<i64: 128, 128>}, {pipeline_mode = #tpu.pipeline_mode<synchronous>, transform_indices = @transform_3, window_bounds = array<i64: 1, 128>}, {transform_indices = @transform_4, window_bounds = array<i64: 128, 128>}]} {
    %c0_i32 = arith.constant 0 : i32
    %0 = arith.cmpi eq, %arg1, %c0_i32 : i32
    %1 = arith.extui %0 : i1 to i32
    %c0_i32_0 = arith.constant 0 : i32
    %2 = arith.cmpi ne, %1, %c0_i32_0 : i32
    scf.if %2 {
      %cst_10 = arith.constant 0.000000e+00 : f32
      %12 = vector.broadcast %cst_10 : f32 to vector<128x128xf32>
      %c0_11 = arith.constant 0 : index
      %c0_12 = arith.constant 0 : index
      %13 = vector.load %arg7[%c0_11, %c0_12] : memref<128x128xf32, #tpu.memory_space<vmem>>, vector<128x128xf32>
      tpu.vector_store %arg7[%c0_11, %c0_12], %12 {strides = array<i32>} : memref<128x128xf32, #tpu.memory_space<vmem>>, vector<128x128xf32>,
    } else {
    }
    %c0 = arith.constant 0 : index
    %c0_1 = arith.constant 0 : index
    %3 = vector.load %arg7[%c0, %c0_1] : memref<128x128xf32, #tpu.memory_space<vmem>>, vector<128x128xf32>
    %c0_2 = arith.constant 0 : index
    %c0_3 = arith.constant 0 : index
    %4 = vector.load %arg2[%c0_2, %c0_3] : memref<128x128xbf16, #tpu.memory_space<vmem>>, vector<128x128xbf16>
    %c0_4 = arith.constant 0 : index
    %c0_5 = arith.constant 0 : index
    %5 = vector.load %arg3[%c0_4, %c0_5] : memref<128x128xbf16, #tpu.memory_space<vmem>>, vector<128x128xbf16>
    %cst = arith.constant dense<0.000000e+00> : vector<128x128xf32>
    %6 = tpu.matmul %4, %5, %cst {dimension_numbers = #tpu.dot_dimension_numbers<[1], [0], [0], [1], [0, 0, 1, 1], [], []>} : vector<128x128xbf16>, vector<128x128xbf16>, vector<128x128xf32> -> vector<128x128xf32>
    %7 = arith.addf %3, %6 : vector<128x128xf32>
    %c0_6 = arith.constant 0 : index
    %c0_7 = arith.constant 0 : index
    %8 = vector.load %arg7[%c0_6, %c0_7] : memref<128x128xf32, #tpu.memory_space<vmem>>, vector<128x128xf32>
    tpu.vector_store %arg7[%c0_6, %c0_7], %7 {strides = array<i32>} : memref<128x128xf32, #tpu.memory_space<vmem>>, vector<128x128xf32>,
    %c0_i32_8 = arith.constant 0 : i32
    %9 = arith.cmpi eq, %arg1, %c0_i32_8 : i32
    %10 = arith.extui %9 : i1 to i32
    %c0_i32_9 = arith.constant 0 : i32
    %11 = arith.cmpi ne, %10, %c0_i32_9 : i32
    scf.if %11 {
      %c0_10 = arith.constant 0 : index
      %c0_11 = arith.constant 0 : index
      %12 = vector.load %arg7[%c0_10, %c0_11] : memref<128x128xf32, #tpu.memory_space<vmem>>, vector<128x128xf32>
      %c0_12 = arith.constant 0 : index
      %c0_13 = arith.constant 0 : index
      %13 = vector.load %arg4[%c0_12, %c0_13] : memref<128x128xf32, #tpu.memory_space<vmem>>, vector<128x128xf32>
      %cst_14 = arith.constant dense<0.000000e+00> : vector<128x128xf32>
      %14 = tpu.matmul %12, %13, %cst_14 {dimension_numbers = #tpu.dot_dimension_numbers<[1], [0], [0], [1], [0, 0, 1, 1], [], []>} : vector<128x128xf32>, vector<128x128xf32>, vector<128x128xf32> -> vector<128x128xf32>
      %c0_15 = arith.constant 0 : index
      %c0_16 = arith.constant 0 : index
      %15 = vector.load %arg5[%c0_15, %c0_16] : memref<1x128xf32, #tpu.memory_space<vmem>>, vector<1x128xf32>
      %16 = vector.broadcast %15 : vector<1x128xf32> to vector<128x128xf32>
      %17 = arith.addf %14, %16 : vector<128x128xf32>
      %c0_17 = arith.constant 0 : index
      %c0_18 = arith.constant 0 : index
      %18 = vector.load %arg6[%c0_17, %c0_18] : memref<128x128xf32, #tpu.memory_space<vmem>>, vector<128x128xf32>
      tpu.vector_store %arg6[%c0_17, %c0_18], %17 {strides = array<i32>} : memref<128x128xf32, #tpu.memory_space<vmem>>, vector<128x128xf32>,
    } else {
    }
    return
  }
  func.func @transform_0(%arg0: i32, %arg1: i32) -> (i32, i32) {
    %c0_i32 = arith.constant 0 : i32
    return %arg0, %arg1 : i32, i32
  }
  func.func @transform_1(%arg0: i32, %arg1: i32) -> (i32, i32) {
    %c0_i32 = arith.constant 0 : i32
    %c0_i32_0 = arith.constant 0 : i32
    return %arg1, %c0_i32 : i32, i32
  }
  func.func @transform_2(%arg0: i32, %arg1: i32) -> (i32, i32) {
    %c0_i32 = arith.constant 0 : i32
    %c0_i32_0 = arith.constant 0 : i32
    %c0_i32_1 = arith.constant 0 : i32
    return %c0_i32, %c0_i32_0 : i32, i32
  }
  func.func @transform_3(%arg0: i32, %arg1: i32) -> (i32, i32) {
    %c0_i32 = arith.constant 0 : i32
    %c0_i32_0 = arith.constant 0 : i32
    %c0_i32_1 = arith.constant 0 : i32
    return %c0_i32, %c0_i32_0 : i32, i32
  }
  func.func @transform_4(%arg0: i32, %arg1: i32) -> (i32, i32) {
    %c0_i32 = arith.constant 0 : i32
    %c0_i32_0 = arith.constant 0 : i32
    return %arg0, %c0_i32 : i32, i32
  }
}

</mosaic_0001>

<bundles_post_ra>
// kernel: gcn_forward.2
= control target key start
LH: loop header
LB: loop body
LE: loop exit
PB: predicated region body
PF: predicated region fallthrough
CT: control target
= control target key end

     0   :  { %s718_s1 = inlined_call_operand.vmem [shape: bf16[128,128], index: 1, kind: input, shape index: {}]   ;;  %s719_s0 = inlined_call_operand.vmem [shape: bf16[128,128], index: 0, kind: input, shape index: {}]   ;;  %s720_s2 = inlined_call_operand.vmem [shape: f32[128,128], index: 2, kind: input, shape index: {}]   ;;  %s721_s3 = inlined_call_operand.vmem [shape: f32[1,128], index: 3, kind: input, shape index: {}]   ;;  %s722_s4 = inlined_call_operand.vmem [shape: bf16[128,128], index: 4, kind: output, shape index: {}]  }
   0x1   :  { %v497_v0 = vld [vmem:[%s718_s1 + $0x38] sm:$0xff]  ;;  %v496_v1 = vld [vmem:[%s718_s1 + $0x30] sm:$0xff]  ;;  %v495_v2 = vld [vmem:[%s718_s1 + $0x28] sm:$0xff] }
   0x2   :  { %545 = vmatpush.bf16.msra.mxu2 %v497_v0  ;;  %181 = vmatpush.bf16.msra.mxu0 %v497_v0  ;;  %v494_v3 = vld [vmem:[%s718_s1 + $0x20] sm:$0xff]  ;;  %v493_v4 = vld [vmem:[%s718_s1 + $0x18] sm:$0xff]  ;;  %v492_v5 = vld [vmem:[%s718_s1 + $0x10] sm:$0xff] }
   0x3   :  { %v491_v6 = vld [vmem:[%s718_s1 + $0x8] sm:$0xff]  ;;  %v490_v7 = vld [vmem:[%s718_s1] sm:$0xff]  ;;  %v296_v12 = vld [vmem:[%s720_s2 + $0x78] sm:$0xff] }
   0x4   :  { %v486_v8 = vld [vmem:[%s719_s0 + $0x20] sm:$0xff]  ;;  %v487_v10 = vld [vmem:[%s719_s0 + $0x28] sm:$0xff]  ;;  %v295_v13 = vld [vmem:[%s720_s2 + $0x70] sm:$0xff]  ;;  %301 = vmatpush.msra.mxu1 %v296_v12  ;;  %553 = vmatpush.msra.mxu3 %v296_v12 }
   0x5   :  { %v482_v9 = vld [vmem:[%s719_s0] sm:$0xff]  ;;  %v483_v11 = vld [vmem:[%s719_s0 + $0x8] sm:$0xff]  ;;  %v292_v16 = vld [vmem:[%s720_s2 + $0x58] sm:$0xff] }
   0x6   :  { %546 = vmatpush.bf16.msra.mxu2 %v496_v1  ;;  %182 = vmatpush.bf16.msra.mxu0 %v496_v1  ;;  %v294_v14 = vld [vmem:[%s720_s2 + $0x68] sm:$0xff]  ;;  %v293_v15 = vld [vmem:[%s720_s2 + $0x60] sm:$0xff]  ;;  %v291_v17 = vld [vmem:[%s720_s2 + $0x50] sm:$0xff] }
   0x7   :  { %302 = vmatpush.msra.mxu1 %v295_v13  ;;  %554 = vmatpush.msra.mxu3 %v295_v13  ;;  %v290_v18 = vld [vmem:[%s720_s2 + $0x48] sm:$0xff]  ;;  %v488_v19 = vld [vmem:[%s719_s0 + $0x30] sm:$0xff]  ;;  %v289_v21 = vld [vmem:[%s720_s2 + $0x40] sm:$0xff] }
   0x8   :  { %v484_v20 = vld [vmem:[%s719_s0 + $0x10] sm:$0xff]  ;;  %v288_v22 = vld [vmem:[%s720_s2 + $0x38] sm:$0xff]  ;;  %v286_v24 = vld [vmem:[%s720_s2 + $0x28] sm:$0xff] }
   0x9   :  { %303 = vmatpush.msra.mxu1 %v294_v14  ;;  %555 = vmatpush.msra.mxu3 %v294_v14  ;;  %v287_v23 = vld [vmem:[%s720_s2 + $0x30] sm:$0xff]  ;;  %v285_v25 = vld [vmem:[%s720_s2 + $0x20] sm:$0xff]  ;;  %v284_v26 = vld [vmem:[%s720_s2 + $0x18] sm:$0xff] }
   0xa   :  { %547 = vmatpush.bf16.msra.mxu2 %v495_v2  ;;  %183 = vmatpush.bf16.msra.mxu0 %v495_v2  ;;  %v283_v27 = vld [vmem:[%s720_s2 + $0x10] sm:$0xff]  ;;  %v282_v28 = vld [vmem:[%s720_s2 + $0x8] sm:$0xff]  ;;  %v489_v29 = vld [vmem:[%s719_s0 + $0x38] sm:$0xff] }
   0xb   :  { %304 = vmatpush.msra.mxu1 %v293_v15  ;;  %556 = vmatpush.msra.mxu3 %v293_v15  ;;  %v485_v30 = vld [vmem:[%s719_s0 + $0x18] sm:$0xff]  ;;  %v281_v31 = vld [vmem:[%s720_s2] sm:$0xff] }
   0xc   :  { %v569_v49 = vld [vmem:[%s721_s3] ss:$0 sm:$0xff] }
   0xd   :  { %305 = vmatpush.msra.mxu1 %v292_v16  ;;  %557 = vmatpush.msra.mxu3 %v292_v16 }
   0xe   :  { %548 = vmatpush.bf16.msra.mxu2 %v494_v3  ;;  %184 = vmatpush.bf16.msra.mxu0 %v494_v3 }
   0xf   :  { %306 = vmatpush.msra.mxu1 %v291_v17  ;;  %558 = vmatpush.msra.mxu3 %v291_v17 }
  0x11   :  { %307 = vmatpush.msra.mxu1 %v290_v18  ;;  %559 = vmatpush.msra.mxu3 %v290_v18 }
  0x12   :  { %549 = vmatpush.bf16.msra.mxu2 %v493_v4  ;;  %185 = vmatpush.bf16.msra.mxu0 %v493_v4 }
  0x13   :  { %308 = vmatpush.msra.mxu1 %v289_v21  ;;  %560 = vmatpush.msra.mxu3 %v289_v21 }
  0x15   :  { %309 = vmatpush.msra.mxu1 %v288_v22  ;;  %561 = vmatpush.msra.mxu3 %v288_v22 }
  0x16   :  { %550 = vmatpush.bf16.msra.mxu2 %v492_v5  ;;  %186 = vmatpush.bf16.msra.mxu0 %v492_v5 }
  0x17   :  { %310 = vmatpush.msra.mxu1 %v287_v23  ;;  %562 = vmatpush.msra.mxu3 %v287_v23 }
  0x19   :  { %311 = vmatpush.msra.mxu1 %v286_v24  ;;  %563 = vmatpush.msra.mxu3 %v286_v24 }
  0x1a   :  { %551 = vmatpush.bf16.msra.mxu2 %v491_v6  ;;  %187 = vmatpush.bf16.msra.mxu0 %v491_v6 }
  0x1b   :  { %312 = vmatpush.msra.mxu1 %v285_v25  ;;  %564 = vmatpush.msra.mxu3 %v285_v25 }
  0x1d   :  { %313 = vmatpush.msra.mxu1 %v284_v26  ;;  %565 = vmatpush.msra.mxu3 %v284_v26 }
  0x1e   :  { %552 = vmatpush.bf16.msra.mxu2 %v490_v7  ;;  %188 = vmatpush.bf16.msra.mxu0 %v490_v7 }
  0x1f   :  { %314 = vmatpush.msra.mxu1 %v283_v27  ;;  %566 = vmatpush.msra.mxu3 %v283_v27 }
  0x21   :  { %209 = vmatmul.bf16.vlgmr.msra.gmra.mxu2 %v486_v8  ;;  %189 = vmatmul.bf16.vlgmr.msra.gmra.mxu0 %v482_v9 }
  0x22   :  { %315 = vmatpush.msra.mxu1 %v282_v28  ;;  %567 = vmatpush.msra.mxu3 %v282_v28 }
  0x24   :  { %316 = vmatpush.msra.mxu1 %v281_v31  ;;  %568 = vmatpush.msra.mxu3 %v281_v31 }
  0x31   :  { %214 = vmatmul.bf16.gmra.mxu2 %v487_v10  ;;  %194 = vmatmul.bf16.gmra.mxu0 %v483_v11 }
  0x41   :  { %219 = vmatmul.bf16.gmra.mxu2 %v488_v19  ;;  %199 = vmatmul.bf16.gmra.mxu0 %v484_v20 }
  0x51   :  { %224 = vmatmul.bf16.gmra.mxu2 %v489_v29  ;;  %204 = vmatmul.bf16.gmra.mxu0 %v485_v30 }
  0x9e   :  { %v190_v32 = vpop.f32.mrf.mxu0 }
  0x9f   :  { %317 = vmatmul.f32.vlgmr.msra.gmra.mxu1 %v190_v32 }
  0xa4   :  { %v210_v33 = vpop.f32.mrf.mxu2 }
  0xa5   :  { %341 = vmatmul.f32.vlgmr.msra.gmra.mxu3 %v210_v33 }
  0xa6   :  { %v192_v34 = vpop.f32.mrf.mxu0 }
  0xa7   :  { %320 = vmatmul.f32.gmra.mxu1 %v192_v34 }
  0xac   :  { %v212_v35 = vpop.f32.mrf.mxu2 }
  0xad   :  { %344 = vmatmul.f32.gmra.mxu3 %v212_v35 }
  0xae   :  { %v195_v36 = vpop.f32.mrf.mxu0 }
  0xaf   :  { %323 = vmatmul.f32.gmra.mxu1 %v195_v36 }
  0xb4   :  { %v215_v37 = vpop.f32.mrf.mxu2 }
  0xb5   :  { %347 = vmatmul.f32.gmra.mxu3 %v215_v37 }
  0xb6   :  { %v197_v38 = vpop.f32.mrf.mxu0 }
  0xb7   :  { %326 = vmatmul.f32.gmra.mxu1 %v197_v38 }
  0xbc   :  { %v217_v39 = vpop.f32.mrf.mxu2 }
  0xbd   :  { %350 = vmatmul.f32.gmra.mxu3 %v217_v39 }
  0xbe   :  { %v200_v40 = vpop.f32.mrf.mxu0 }
  0xbf   :  { %329 = vmatmul.f32.gmra.mxu1 %v200_v40 }
  0xc4   :  { %v220_v41 = vpop.f32.mrf.mxu2 }
  0xc5   :  { %353 = vmatmul.f32.gmra.mxu3 %v220_v41 }
  0xc6   :  { %v202_v42 = vpop.f32.mrf.mxu0 }
  0xc7   :  { %332 = vmatmul.f32.gmra.mxu1 %v202_v42 }
  0xcc   :  { %v222_v43 = vpop.f32.mrf.mxu2 }
  0xcd   :  { %356 = vmatmul.f32.gmra.mxu3 %v222_v43 }
  0xce   :  { %v205_v44 = vpop.f32.mrf.mxu0 }
  0xcf   :  { %335 = vmatmul.f32.gmra.mxu1 %v205_v44 }
  0xd4   :  { %v225_v45 = vpop.f32.mrf.mxu2 }
  0xd5   :  { %359 = vmatmul.f32.gmra.mxu3 %v225_v45 }
  0xd6   :  { %v207_v46 = vpop.f32.mrf.mxu0 }
  0xd7   :  { %338 = vmatmul.f32.gmra.mxu1 %v207_v46 }
  0xdc   :  { %v227_v47 = vpop.f32.mrf.mxu2 }
  0xdd   :  { %362 = vmatmul.f32.gmra.mxu3 %v227_v47 }
 0x11c   :  { %v318_v48 = vpop.f32.mrf.mxu1 }
 0x11d   :  { %v319_v50 = vadd.f32 %v569_v49, %v318_v48 }
 0x11f   :  { %v366_v52 = vmax.f32 %v319_v50, 0.0 }
 0x124   :  { %v321_v51 = vpop.f32.mrf.mxu1 }
 0x125   :  { %v322_v53 = vadd.f32 %v569_v49, %v321_v51 }
 0x127   :  { %v367_v54 = vmax.f32 %v322_v53, 0.0 }
 0x128   :  { %v342_v55 = vpop.f32.mrf.mxu3 }
 0x129   :  { %v501_v56 = vpack.c.bf16 %v367_v54, %v366_v52  ;;  %v343_v58 = vadd.f32 %v569_v49, %v342_v55 }
 0x12b   :  { %502 = vst [vmem:[%s722_s4] sm:$0xff] %v501_v56   ;;  %v374_v62 = vmax.f32 %v343_v58, 0.0 }
 0x12c   :  { %v324_v57 = vpop.f32.mrf.mxu1 }
 0x12d   :  { %v325_v60 = vadd.f32 %v569_v49, %v324_v57 }
 0x12f   :  { %v368_v1 = vmax.f32 %v325_v60, 0.0 }
 0x130   :  { %v345_v59 = vpop.f32.mrf.mxu3 }
 0x131   :  { %v346_v61 = vadd.f32 %v569_v49, %v345_v59 }
 0x133   :  { %v375_v63 = vmax.f32 %v346_v61, 0.0 }
 0x134   :  { %v327_v0 = vpop.f32.mrf.mxu1 }
 0x135   :  { %v521_v2 = vpack.c.bf16 %v375_v63, %v374_v62  ;;  %v328_v3 = vadd.f32 %v569_v49, %v327_v0 }
 0x137   :  { %541 = vst [vmem:[%s722_s4 + $0x20] sm:$0xff] %v521_v2   ;;  %v369_v4 = vmax.f32 %v328_v3, 0.0 }
 0x138   :  { %v348_v5 = vpop.f32.mrf.mxu3 }
 0x139   :  { %v506_v6 = vpack.c.bf16 %v369_v4, %v368_v1  ;;  %v349_v8 = vadd.f32 %v569_v49, %v348_v5 }
 0x13b   :  { %538 = vst [vmem:[%s722_s4 + $0x8] sm:$0xff] %v506_v6   ;;  %v376_v12 = vmax.f32 %v349_v8, 0.0 }
 0x13c   :  { %v330_v7 = vpop.f32.mrf.mxu1 }
 0x13d   :  { %v331_v10 = vadd.f32 %v569_v49, %v330_v7 }
 0x13f   :  { %v370_v15 = vmax.f32 %v331_v10, 0.0 }
 0x140   :  { %v351_v9 = vpop.f32.mrf.mxu3 }
 0x141   :  { %v352_v11 = vadd.f32 %v569_v49, %v351_v9 }
 0x143   :  { %v377_v13 = vmax.f32 %v352_v11, 0.0 }
 0x144   :  { %v333_v14 = vpop.f32.mrf.mxu1 }
 0x145   :  { %v526_v16 = vpack.c.bf16 %v377_v13, %v376_v12  ;;  %v334_v17 = vadd.f32 %v569_v49, %v333_v14 }
 0x147   :  { %542 = vst [vmem:[%s722_s4 + $0x28] sm:$0xff] %v526_v16   ;;  %v371_v18 = vmax.f32 %v334_v17, 0.0 }
 0x148   :  { %v354_v19 = vpop.f32.mrf.mxu3 }
 0x149   :  { %v511_v20 = vpack.c.bf16 %v371_v18, %v370_v15  ;;  %v355_v22 = vadd.f32 %v569_v49, %v354_v19 }
 0x14b   :  { %539 = vst [vmem:[%s722_s4 + $0x10] sm:$0xff] %v511_v20   ;;  %v378_v26 = vmax.f32 %v355_v22, 0.0 }
 0x14c   :  { %v336_v21 = vpop.f32.mrf.mxu1 }
 0x14d   :  { %v337_v24 = vadd.f32 %v569_v49, %v336_v21 }
 0x14f   :  { %v372_v29 = vmax.f32 %v337_v24, 0.0 }
 0x150   :  { %v357_v23 = vpop.f32.mrf.mxu3 }
 0x151   :  { %v358_v25 = vadd.f32 %v569_v49, %v357_v23 }
 0x153   :  { %v379_v27 = vmax.f32 %v358_v25, 0.0 }
 0x154   :  { %v339_v28 = vpop.f32.mrf.mxu1 }
 0x155   :  { %v531_v30 = vpack.c.bf16 %v379_v27, %v378_v26  ;;  %v340_v31 = vadd.f32 %v569_v49, %v339_v28 }
 0x157   :  { %543 = vst [vmem:[%s722_s4 + $0x30] sm:$0xff] %v531_v30   ;;  %v373_v32 = vmax.f32 %v340_v31, 0.0 }
 0x158   :  { %v360_v33 = vpop.f32.mrf.mxu3 }
 0x159   :  { %v516_v34 = vpack.c.bf16 %v373_v32, %v372_v29  ;;  %v361_v35 = vadd.f32 %v569_v49, %v360_v33 }
 0x15b   :  { %540 = vst [vmem:[%s722_s4 + $0x18] sm:$0xff] %v516_v34   ;;  %v380_v38 = vmax.f32 %v361_v35, 0.0 }
 0x160   :  { %v363_v36 = vpop.f32.mrf.mxu3 }
 0x161   :  { %v364_v37 = vadd.f32 %v569_v49, %v363_v36 }
 0x163   :  { %v381_v39 = vmax.f32 %v364_v37, 0.0 }
 0x165   :  { %v536_v40 = vpack.c.bf16 %v381_v39, %v380_v38 }
 0x167   :  { %544 = vst [vmem:[%s722_s4 + $0x38] sm:$0xff] %v536_v40  }

// kernel: gcn_forward.3
= control target key start
LH: loop header
LB: loop body
LE: loop exit
PB: predicated region body
PF: predicated region fallthrough
CT: control target
= control target key end

     0   :  { %s663_s1 = inlined_call_operand.vmem [shape: bf16[128,128], index: 1, kind: input, shape index: {}]   ;;  %s664_s0 = inlined_call_operand.vmem [shape: bf16[128,128], index: 0, kind: input, shape index: {}]   ;;  %s665_s2 = inlined_call_operand.vmem [shape: f32[128,128], index: 2, kind: input, shape index: {}]   ;;  %s666_s3 = inlined_call_operand.vmem [shape: f32[1,128], index: 3, kind: input, shape index: {}]   ;;  %s667_s4 = inlined_call_operand.vmem [shape: f32[128,128], index: 4, kind: output, shape index: {}]  }
   0x1   :  { %v465_v0 = vld [vmem:[%s663_s1 + $0x38] sm:$0xff]  ;;  %v464_v1 = vld [vmem:[%s663_s1 + $0x30] sm:$0xff]  ;;  %v463_v2 = vld [vmem:[%s663_s1 + $0x28] sm:$0xff] }
   0x2   :  { %466 = vmatpush.bf16.msra.mxu2 %v465_v0  ;;  %181 = vmatpush.bf16.msra.mxu0 %v465_v0  ;;  %v462_v3 = vld [vmem:[%s663_s1 + $0x20] sm:$0xff]  ;;  %v461_v4 = vld [vmem:[%s663_s1 + $0x18] sm:$0xff]  ;;  %v460_v5 = vld [vmem:[%s663_s1 + $0x10] sm:$0xff] }
   0x3   :  { %v459_v6 = vld [vmem:[%s663_s1 + $0x8] sm:$0xff]  ;;  %v458_v7 = vld [vmem:[%s663_s1] sm:$0xff]  ;;  %v296_v12 = vld [vmem:[%s665_s2 + $0x78] sm:$0xff] }
   0x4   :  { %v454_v8 = vld [vmem:[%s664_s0 + $0x20] sm:$0xff]  ;;  %v455_v10 = vld [vmem:[%s664_s0 + $0x28] sm:$0xff]  ;;  %v295_v13 = vld [vmem:[%s665_s2 + $0x70] sm:$0xff]  ;;  %301 = vmatpush.msra.mxu1 %v296_v12  ;;  %474 = vmatpush.msra.mxu3 %v296_v12 }
   0x5   :  { %v450_v9 = vld [vmem:[%s664_s0] sm:$0xff]  ;;  %v451_v11 = vld [vmem:[%s664_s0 + $0x8] sm:$0xff]  ;;  %v292_v16 = vld [vmem:[%s665_s2 + $0x58] sm:$0xff] }
   0x6   :  { %467 = vmatpush.bf16.msra.mxu2 %v464_v1  ;;  %182 = vmatpush.bf16.msra.mxu0 %v464_v1  ;;  %v294_v14 = vld [vmem:[%s665_s2 + $0x68] sm:$0xff]  ;;  %v293_v15 = vld [vmem:[%s665_s2 + $0x60] sm:$0xff]  ;;  %v291_v17 = vld [vmem:[%s665_s2 + $0x50] sm:$0xff] }
   0x7   :  { %302 = vmatpush.msra.mxu1 %v295_v13  ;;  %475 = vmatpush.msra.mxu3 %v295_v13  ;;  %v290_v18 = vld [vmem:[%s665_s2 + $0x48] sm:$0xff]  ;;  %v456_v19 = vld [vmem:[%s664_s0 + $0x30] sm:$0xff]  ;;  %v289_v21 = vld [vmem:[%s665_s2 + $0x40] sm:$0xff] }
   0x8   :  { %v452_v20 = vld [vmem:[%s664_s0 + $0x10] sm:$0xff]  ;;  %v288_v22 = vld [vmem:[%s665_s2 + $0x38] sm:$0xff]  ;;  %v286_v24 = vld [vmem:[%s665_s2 + $0x28] sm:$0xff] }
   0x9   :  { %303 = vmatpush.msra.mxu1 %v294_v14  ;;  %476 = vmatpush.msra.mxu3 %v294_v14  ;;  %v287_v23 = vld [vmem:[%s665_s2 + $0x30] sm:$0xff]  ;;  %v285_v25 = vld [vmem:[%s665_s2 + $0x20] sm:$0xff]  ;;  %v284_v26 = vld [vmem:[%s665_s2 + $0x18] sm:$0xff] }
   0xa   :  { %468 = vmatpush.bf16.msra.mxu2 %v463_v2  ;;  %183 = vmatpush.bf16.msra.mxu0 %v463_v2  ;;  %v283_v27 = vld [vmem:[%s665_s2 + $0x10] sm:$0xff]  ;;  %v282_v28 = vld [vmem:[%s665_s2 + $0x8] sm:$0xff]  ;;  %v457_v29 = vld [vmem:[%s664_s0 + $0x38] sm:$0xff] }
   0xb   :  { %304 = vmatpush.msra.mxu1 %v293_v15  ;;  %477 = vmatpush.msra.mxu3 %v293_v15  ;;  %v453_v30 = vld [vmem:[%s664_s0 + $0x18] sm:$0xff]  ;;  %v281_v31 = vld [vmem:[%s665_s2] sm:$0xff] }
   0xc   :  { %v490_v48 = vld [vmem:[%s666_s3] ss:$0 sm:$0xff] }
   0xd   :  { %305 = vmatpush.msra.mxu1 %v292_v16  ;;  %478 = vmatpush.msra.mxu3 %v292_v16 }
   0xe   :  { %469 = vmatpush.bf16.msra.mxu2 %v462_v3  ;;  %184 = vmatpush.bf16.msra.mxu0 %v462_v3 }
   0xf   :  { %306 = vmatpush.msra.mxu1 %v291_v17  ;;  %479 = vmatpush.msra.mxu3 %v291_v17 }
  0x11   :  { %307 = vmatpush.msra.mxu1 %v290_v18  ;;  %480 = vmatpush.msra.mxu3 %v290_v18 }
  0x12   :  { %470 = vmatpush.bf16.msra.mxu2 %v461_v4  ;;  %185 = vmatpush.bf16.msra.mxu0 %v461_v4 }
  0x13   :  { %308 = vmatpush.msra.mxu1 %v289_v21  ;;  %481 = vmatpush.msra.mxu3 %v289_v21 }
  0x15   :  { %309 = vmatpush.msra.mxu1 %v288_v22  ;;  %482 = vmatpush.msra.mxu3 %v288_v22 }
  0x16   :  { %471 = vmatpush.bf16.msra.mxu2 %v460_v5  ;;  %186 = vmatpush.bf16.msra.mxu0 %v460_v5 }
  0x17   :  { %310 = vmatpush.msra.mxu1 %v287_v23  ;;  %483 = vmatpush.msra.mxu3 %v287_v23 }
  0x19   :  { %311 = vmatpush.msra.mxu1 %v286_v24  ;;  %484 = vmatpush.msra.mxu3 %v286_v24 }
  0x1a   :  { %472 = vmatpush.bf16.msra.mxu2 %v459_v6  ;;  %187 = vmatpush.bf16.msra.mxu0 %v459_v6 }
  0x1b   :  { %312 = vmatpush.msra.mxu1 %v285_v25  ;;  %485 = vmatpush.msra.mxu3 %v285_v25 }
  0x1d   :  { %313 = vmatpush.msra.mxu1 %v284_v26  ;;  %486 = vmatpush.msra.mxu3 %v284_v26 }
  0x1e   :  { %473 = vmatpush.bf16.msra.mxu2 %v458_v7  ;;  %188 = vmatpush.bf16.msra.mxu0 %v458_v7 }
  0x1f   :  { %314 = vmatpush.msra.mxu1 %v283_v27  ;;  %487 = vmatpush.msra.mxu3 %v283_v27 }
  0x21   :  { %209 = vmatmul.bf16.vlgmr.msra.gmra.mxu2 %v454_v8  ;;  %189 = vmatmul.bf16.vlgmr.msra.gmra.mxu0 %v450_v9 }
  0x22   :  { %315 = vmatpush.msra.mxu1 %v282_v28  ;;  %488 = vmatpush.msra.mxu3 %v282_v28 }
  0x24   :  { %316 = vmatpush.msra.mxu1 %v281_v31  ;;  %489 = vmatpush.msra.mxu3 %v281_v31 }
  0x31   :  { %214 = vmatmul.bf16.gmra.mxu2 %v455_v10  ;;  %194 = vmatmul.bf16.gmra.mxu0 %v451_v11 }
  0x41   :  { %219 = vmatmul.bf16.gmra.mxu2 %v456_v19  ;;  %199 = vmatmul.bf16.gmra.mxu0 %v452_v20 }
  0x51   :  { %224 = vmatmul.bf16.gmra.mxu2 %v457_v29  ;;  %204 = vmatmul.bf16.gmra.mxu0 %v453_v30 }
  0x9e   :  { %v190_v32 = vpop.f32.mrf.mxu0 }
  0x9f   :  { %317 = vmatmul.f32.vlgmr.msra.gmra.mxu1 %v190_v32 }
  0xa4   :  { %v210_v33 = vpop.f32.mrf.mxu2 }
  0xa5   :  { %341 = vmatmul.f32.vlgmr.msra.gmra.mxu3 %v210_v33 }
  0xa6   :  { %v192_v34 = vpop.f32.mrf.mxu0 }
  0xa7   :  { %320 = vmatmul.f32.gmra.mxu1 %v192_v34 }
  0xac   :  { %v212_v35 = vpop.f32.mrf.mxu2 }
  0xad   :  { %344 = vmatmul.f32.gmra.mxu3 %v212_v35 }
  0xae   :  { %v195_v36 = vpop.f32.mrf.mxu0 }
  0xaf   :  { %323 = vmatmul.f32.gmra.mxu1 %v195_v36 }
  0xb4   :  { %v215_v37 = vpop.f32.mrf.mxu2 }
  0xb5   :  { %347 = vmatmul.f32.gmra.mxu3 %v215_v37 }
  0xb6   :  { %v197_v38 = vpop.f32.mrf.mxu0 }
  0xb7   :  { %326 = vmatmul.f32.gmra.mxu1 %v197_v38 }
  0xbc   :  { %v217_v39 = vpop.f32.mrf.mxu2 }
  0xbd   :  { %350 = vmatmul.f32.gmra.mxu3 %v217_v39 }
  0xbe   :  { %v200_v40 = vpop.f32.mrf.mxu0 }
  0xbf   :  { %329 = vmatmul.f32.gmra.mxu1 %v200_v40 }
  0xc4   :  { %v220_v41 = vpop.f32.mrf.mxu2 }
  0xc5   :  { %353 = vmatmul.f32.gmra.mxu3 %v220_v41 }
  0xc6   :  { %v202_v42 = vpop.f32.mrf.mxu0 }
  0xc7   :  { %332 = vmatmul.f32.gmra.mxu1 %v202_v42 }
  0xcc   :  { %v222_v43 = vpop.f32.mrf.mxu2 }
  0xcd   :  { %356 = vmatmul.f32.gmra.mxu3 %v222_v43 }
  0xce   :  { %v205_v44 = vpop.f32.mrf.mxu0 }
  0xcf   :  { %335 = vmatmul.f32.gmra.mxu1 %v205_v44 }
  0xd4   :  { %v225_v45 = vpop.f32.mrf.mxu2 }
  0xd5   :  { %359 = vmatmul.f32.gmra.mxu3 %v225_v45 }
  0xd6   :  { %v207_v46 = vpop.f32.mrf.mxu0 }
  0xd7   :  { %338 = vmatmul.f32.gmra.mxu1 %v207_v46 }
  0xdc   :  { %v227_v47 = vpop.f32.mrf.mxu2 }
  0xdd   :  { %362 = vmatmul.f32.gmra.mxu3 %v227_v47 }
 0x11c   :  { %v318_v49 = vpop.f32.mrf.mxu1 }
 0x11d   :  { %v319_v50 = vadd.f32 %v490_v48, %v318_v49 }
 0x11f   :  { %366 = vst [vmem:[%s667_s4] sm:$0xff] %v319_v50 }
 0x124   :  { %v321_v51 = vpop.f32.mrf.mxu1 }
 0x125   :  { %v322_v52 = vadd.f32 %v490_v48, %v321_v51 }
 0x127   :  { %367 = vst [vmem:[%s667_s4 + $0x8] sm:$0xff] %v322_v52 }
 0x128   :  { %v342_v53 = vpop.f32.mrf.mxu3 }
 0x129   :  { %v343_v54 = vadd.f32 %v490_v48, %v342_v53 }
 0x12b   :  { %374 = vst [vmem:[%s667_s4 + $0x40] sm:$0xff] %v343_v54 }
 0x12c   :  { %v324_v55 = vpop.f32.mrf.mxu1 }
 0x12d   :  { %v325_v56 = vadd.f32 %v490_v48, %v324_v55 }
 0x12f   :  { %368 = vst [vmem:[%s667_s4 + $0x10] sm:$0xff] %v325_v56 }
 0x130   :  { %v345_v57 = vpop.f32.mrf.mxu3 }
 0x131   :  { %v346_v58 = vadd.f32 %v490_v48, %v345_v57 }
 0x133   :  { %375 = vst [vmem:[%s667_s4 + $0x48] sm:$0xff] %v346_v58 }
 0x134   :  { %v327_v59 = vpop.f32.mrf.mxu1 }
 0x135   :  { %v328_v60 = vadd.f32 %v490_v48, %v327_v59 }
 0x137   :  { %369 = vst [vmem:[%s667_s4 + $0x18] sm:$0xff] %v328_v60 }
 0x138   :  { %v348_v61 = vpop.f32.mrf.mxu3 }
 0x139   :  { %v349_v62 = vadd.f32 %v490_v48, %v348_v61 }
 0x13b   :  { %376 = vst [vmem:[%s667_s4 + $0x50] sm:$0xff] %v349_v62 }
 0x13c   :  { %v330_v63 = vpop.f32.mrf.mxu1 }
 0x13d   :  { %v331_v0 = vadd.f32 %v490_v48, %v330_v63 }
 0x13f   :  { %370 = vst [vmem:[%s667_s4 + $0x20] sm:$0xff] %v331_v0 }
 0x140   :  { %v351_v1 = vpop.f32.mrf.mxu3 }
 0x141   :  { %v352_v2 = vadd.f32 %v490_v48, %v351_v1 }
 0x143   :  { %377 = vst [vmem:[%s667_s4 + $0x58] sm:$0xff] %v352_v2 }
 0x144   :  { %v333_v3 = vpop.f32.mrf.mxu1 }
 0x145   :  { %v334_v4 = vadd.f32 %v490_v48, %v333_v3 }
 0x147   :  { %371 = vst [vmem:[%s667_s4 + $0x28] sm:$0xff] %v334_v4 }
 0x148   :  { %v354_v5 = vpop.f32.mrf.mxu3 }
 0x149   :  { %v355_v6 = vadd.f32 %v490_v48, %v354_v5 }
 0x14b   :  { %378 = vst [vmem:[%s667_s4 + $0x60] sm:$0xff] %v355_v6 }
 0x14c   :  { %v336_v7 = vpop.f32.mrf.mxu1 }
 0x14d   :  { %v337_v8 = vadd.f32 %v490_v48, %v336_v7 }
 0x14f   :  { %372 = vst [vmem:[%s667_s4 + $0x30] sm:$0xff] %v337_v8 }
 0x150   :  { %v357_v9 = vpop.f32.mrf.mxu3 }
 0x151   :  { %v358_v10 = vadd.f32 %v490_v48, %v357_v9 }
 0x153   :  { %379 = vst [vmem:[%s667_s4 + $0x68] sm:$0xff] %v358_v10 }
 0x154   :  { %v339_v11 = vpop.f32.mrf.mxu1 }
 0x155   :  { %v340_v12 = vadd.f32 %v490_v48, %v339_v11 }
 0x157   :  { %373 = vst [vmem:[%s667_s4 + $0x38] sm:$0xff] %v340_v12 }
 0x158   :  { %v360_v13 = vpop.f32.mrf.mxu3 }
 0x159   :  { %v361_v14 = vadd.f32 %v490_v48, %v360_v13 }
 0x15b   :  { %380 = vst [vmem:[%s667_s4 + $0x70] sm:$0xff] %v361_v14 }
 0x160   :  { %v363_v15 = vpop.f32.mrf.mxu3 }
 0x161   :  { %v364_v16 = vadd.f32 %v490_v48, %v363_v15 }
 0x163   :  { %381 = vst [vmem:[%s667_s4 + $0x78] sm:$0xff] %v364_v16 }

</bundles_post_ra>
